<compile_context>
chip_gen: v5e
topology: v5e:2x2
jax: 0.10.0
libtpu: 0.0.40
codegen_flags: <defaults>
</compile_context>

<pallas_src>
import math
import functools

import jax
import jax.numpy as jnp
from jax.experimental import pallas as pl
from jax.experimental.pallas import tpu as pltpu


def _ndw_kernel(labels_ref, feat_ref, wt_ref, w_inv_ref, logits_ref, weights_ref,
                *, alpha, beta, top_k):
    feat = feat_ref[...].astype(jnp.float32)           # (TB, D)
    wt = wt_ref[...].astype(jnp.float32)                # (D, C)  resident
    labels = labels_ref[...]                            # (TB, 1) int32
    w_inv = w_inv_ref[...]                               # (1, C)  f32, 1/max(|w_c|, eps)

    C = wt.shape[1]

    # logits = feat @ W^T  (F.linear, bias=None) — canonical (TB,D)@(D,C) MXU path.
    logits = jnp.dot(feat, wt, preferred_element_type=jnp.float32,
                     precision=jax.lax.Precision.HIGHEST)             # (TB, C)

    eps2 = jnp.float32(1e-24)                            # (1e-12)^2  (F.normalize eps)
    feat_inv = jax.lax.rsqrt(
        jnp.maximum(jnp.sum(feat * feat, axis=-1, keepdims=True), eps2))   # (TB, 1)

    # Work in cos space (angle = (1 - cos)/2), reusing the single matmul:
    #   cos = logits / (|f| |w|).  Saves a full (TB,C) FMA + temp vs materializing angle.
    cos = logits * feat_inv * w_inv                      # (TB, C)

    class_ids = jax.lax.broadcasted_iota(jnp.int32, (1, C), 1)        # (1, C)
    label_mask = class_ids == labels                     # (TB, C) via broadcast
    # NOTE: out-of-range labels silently give labeled_cos == 0 (no runtime check).
    labeled_cos = jnp.sum(jnp.where(label_mask, cos, 0.0), axis=-1, keepdims=True)

    NEG_BIG = jnp.float32(-1e30)                         # finite: 0 * NEG_BIG == 0
    oo = jnp.where(label_mask, NEG_BIG, cos)             # cos over classes != label

    # Tie-correct streaming selection of the (top_k+1) LARGEST cos among "other"
    # (== top_k+1 smallest angle distances), counting multiplicity.  Each iteration
    # pops >= 1 entry, so top_k+1 iterations always suffice and the sentinel is
    # never summed (take becomes 0 once `remaining` hits 0).
    need = jnp.float32(top_k + 1)
    m0 = jnp.max(oo, axis=-1, keepdims=True)             # max cos  == min other angle
    cnt0 = jnp.sum((oo == m0).astype(jnp.float32), axis=-1, keepdims=True)
    take0 = jnp.minimum(cnt0, need)
    acc0 = take0 * m0
    rem0 = need - take0
    oo0 = jnp.where(oo == m0, NEG_BIG, oo)

    def body(_, carry):
        oo_c, acc_c, rem_c = carry
        m = jnp.max(oo_c, axis=-1, keepdims=True)
        cnt = jnp.sum((oo_c == m).astype(jnp.float32), axis=-1, keepdims=True)
        take = jnp.minimum(cnt, rem_c)
        acc_c = acc_c + take * m
        rem_c = rem_c - take
        oo_c = jnp.where(oo_c == m, NEG_BIG, oo_c)
        return oo_c, acc_c, rem_c

    _, acc, _ = jax.lax.fori_loop(0, top_k, body, (oo0, acc0, rem0),
                                  unroll=(top_k <= 8))
    # mean cos over the top_k "other-other" classes (max removed once)
    cos_mean_sel = (acc - m0) * jnp.float32(1.0 / top_k)

    # Angle differences expressed in cos space:
    #   min_other_angle - labeled_angle = 0.5 * (labeled_cos - m0)
    #   min_other_angle - oo_mean       = 0.5 * (cos_mean_sel - m0)  (<= 0)
    weights = 0.5 * (jax.nn.sigmoid(alpha * 0.5 * (labeled_cos - m0))
                     + jnp.exp(beta * 0.5 * (cos_mean_sel - m0)))    # (TB, 1)

    # F.normalize(logits, dim=-1)
    l_inv = jax.lax.rsqrt(
        jnp.maximum(jnp.sum(logits * logits, axis=-1, keepdims=True), eps2))
    logits_ref[...] = (logits * l_inv).astype(logits_ref.dtype)
    weights_ref[...] = weights.astype(weights_ref.dtype)


def _vmem_capacity_bytes():
    try:
        return int(pltpu.get_tpu_info().vmem_capacity_bytes)
    except Exception:
        return 64 * 1024 * 1024       # conservative fallback (v7x per-TC VMEM)


def _pick_batch_tile(B, C, D, vmem_cap):
    """VMEM/generation-aware batch tile.

    Budget per step (bytes):
      resident (single-buffered): W^T (D*C*4) + w_inv (C*4)
      pipelined (double-buffered): feat 2*tb*D*4, logits out 2*tb*C*4, labels/weights tiny
      live temps: ~4 * tb*C*4 (logits, cos, oo, selection masks)
    """
    budget = int(0.55 * vmem_cap)
    resident = D * C * 4 + C * 4
    tb = 8
    for cand in (512, 256, 128, 64, 32, 16, 8):
        per_step = 2 * cand * D * 4 + 6 * cand * C * 4 + 4 * cand * 8
        if resident + per_step <= budget:
            tb = cand
            break
    # Keep the grid >= 2 steps whenever the batch allows (pipelining / megacore
    # sharding of the "parallel" batch axis).
    while tb > 8 and 2 * tb > B:
        tb //= 2
    return tb


def ndw_forward_kernel(feat, weight, labels, *, alpha, beta, top_k):
    B, D = feat.shape
    C = weight.shape[0]

    # Hoisted parameter preprocessing: one-time transpose to (D, C) for the
    # canonical MXU matmul, plus per-class inverse norms from the same copy.
    wt = weight.astype(jnp.float32).T                                          # (D, C)
    w_inv = jax.lax.rsqrt(
        jnp.maximum(jnp.sum(wt * wt, axis=0, keepdims=True), jnp.float32(1e-24)))  # (1, C)

    # Guard degenerate configs (need top_k+1 <= C-1 real "other" entries).
    top_k = max(min(int(top_k), C - 2), 1)

    vmem_cap = _vmem_capacity_bytes()
    tb = _pick_batch_tile(B, C, D, vmem_cap)
    B_pad = ((B + tb - 1) // tb) * tb

    labels2d = labels.astype(jnp.int32).reshape(B, 1)
    feat_p = feat
    if B_pad != B:
        feat_p = jnp.pad(feat, ((0, B_pad - B), (0, 0)))
        labels2d = jnp.pad(labels2d, ((0, B_pad - B), (0, 0)))

    grid = (B_pad // tb,)
    kernel = functools.partial(_ndw_kernel, alpha=float(alpha), beta=float(beta),
                               top_k=top_k)

    cost = pl.CostEstimate(
        flops=int(2 * B_pad * C * D + 8 * B_pad * C * (top_k + 2)),
        transcendentals=int(4 * B_pad),
        bytes_accessed=int(4 * (B_pad * D + D * C + B_pad * C + 2 * B_pad + C)))
    vmem_limit = max(32 * 1024 * 1024, min(int(0.70 * vmem_cap), 96 * 1024 * 1024))

    def _call(single_buffer_invariants):
        if single_buffer_invariants:
            def const_spec(shape):
                return pl.BlockSpec(shape, lambda i: (0, 0),
                                    pipeline_mode=pl.Buffered(1))
        else:
            def const_spec(shape):
                return pl.BlockSpec(shape, lambda i: (0, 0))

        gs = pl.GridSpec(
            grid=grid,
            in_specs=[pl.BlockSpec((tb, 1), lambda i: (i, 0)),   # labels (per tile)
                      pl.BlockSpec((tb, D), lambda i: (i, 0)),   # feat   (per tile)
                      const_spec((D, C)),                        # W^T    (resident)
                      const_spec((1, C))],                       # w_inv  (resident)
            out_specs=[pl.BlockSpec((tb, C), lambda i: (i, 0)),
                       pl.BlockSpec((tb, 1), lambda i: (i, 0))],
        )
        return pl.pallas_call(
            kernel,
            grid_spec=gs,
            out_shape=(jax.ShapeDtypeStruct((B_pad, C), jnp.float32),
                       jax.ShapeDtypeStruct((B_pad, 1), jnp.float32)),
            compiler_params=pltpu.CompilerParams(
                dimension_semantics=("parallel",),
                vmem_limit_bytes=vmem_limit),
            cost_estimate=cost,
        )(labels2d, feat_p, wt, w_inv)

    try:
        logits_n, weights = _call(True)
    except Exception:
        # Fallback if this JAX build rejects single-buffered invariant operands.
        logits_n, weights = _call(False)

    if B_pad != B:
        logits_n = logits_n[:B]
        weights = weights[:B]
    return logits_n, weights


def natural_distance_weighting_forward(feat, weight, labels, idx, ep, add_weights,
                                       *, alpha, beta, top_rate, train_epoch):
    """Full forward (non-mixup path). Returns (normalized_logits, out_weights, new_add_weights)."""
    C = weight.shape[0]
    top_k = max(int((C - 2) * top_rate), 1)

    logits_n, weights = ndw_forward_kernel(feat, weight, labels,
                                           alpha=alpha, beta=beta, top_k=top_k)
    w_vec = weights[:, 0]                                       # (B,)

    # stateful annealing bookkeeping (scalar glue, plain JAX)
    add_weights = add_weights.at[ep, idx].set(w_vec)
    descends = jax.nn.softmax(
        jnp.array([1.0 + math.cos(i / train_epoch * math.pi) for i in range(ep + 1)],
                  dtype=jnp.float32))[:, None]                  # (ep+1, 1)
    final_weights = jnp.sum(add_weights[:ep + 1][:, idx] * descends, axis=0)[:, None]  # (B, 1)
    return logits_n, final_weights, add_weights


def _reference(feat, weight, labels, *, alpha, beta, top_k):
    """Pure-JAX reference of the kernel part (PyTorch-faithful), for correctness check."""
    hi = jax.lax.Precision.HIGHEST
    logits = jnp.dot(feat, weight.T, precision=hi)
    nfeat = feat / jnp.maximum(jnp.linalg.norm(feat, axis=1, keepdims=True), 1e-12)
    nmeans = weight / jnp.maximum(jnp.linalg.norm(weight, axis=1, keepdims=True), 1e-12)
    angle = (1.0 - jnp.dot(nfeat, nmeans.T, precision=hi)) / 2.0
    B, C = angle.shape
    labeled = jnp.take_along_axis(angle, labels[:, None], axis=-1)[:, 0]
    other = jnp.where(jnp.arange(C)[None, :] == labels[:, None], jnp.inf, angle)
    min_other = jnp.min(other, axis=-1)
    amin = jnp.argmin(other, axis=-1)
    oo = jnp.where(jnp.arange(C)[None, :] == amin[:, None], jnp.inf, other)
    oo_sorted = jnp.sort(oo, axis=-1)[:, :top_k]
    oo_mean = jnp.mean(oo_sorted, axis=-1)
    w = 0.5 * (jax.nn.sigmoid(alpha * (min_other - labeled))
               + jnp.exp(beta * (min_other - oo_mean)))
    ln = logits / jnp.maximum(jnp.linalg.norm(logits, axis=-1, keepdims=True), 1e-12)
    return ln, w


if __name__ == "__main__":
    # small shapes
    B, D, C = 8, 32, 16          # batch, feat_dim, num_classes
    train_size, train_epoch = 64, 10
    alpha, beta, top_rate = 100.0, 100.0, 0.01
    ep = 3

    key = jax.random.PRNGKey(0)
    k_feat, k_w, k_lab = jax.random.split(key, 3)

    feat = jax.random.normal(k_feat, (B, D), dtype=jnp.float32)
    # kaiming_uniform_(a=sqrt(5)) on (C, D): bound = 1/sqrt(fan_in) = 1/sqrt(D)
    bound = 1.0 / math.sqrt(D)
    weight = jax.random.uniform(k_w, (C, D), minval=-bound, maxval=bound, dtype=jnp.float32)
    labels = jax.random.randint(k_lab, (B,), 0, C, dtype=jnp.int32)
    idx = jnp.arange(B, dtype=jnp.int32)
    add_weights = jnp.zeros((train_epoch, train_size), dtype=jnp.float32)

    logits_n, out_weights, add_weights = natural_distance_weighting_forward(
        feat, weight, labels, idx, ep, add_weights,
        alpha=alpha, beta=beta, top_rate=top_rate, train_epoch=train_epoch)
    jax.block_until_ready((logits_n, out_weights))

    # correctness check of kernel outputs against pure-JAX reference
    top_k = max(int((C - 2) * top_rate), 1)
    ref_logits, ref_w = _reference(feat, weight, labels, alpha=alpha, beta=beta, top_k=top_k)
    descends = jax.nn.softmax(
        jnp.array([1.0 + math.cos(i / train_epoch * math.pi) for i in range(ep + 1)],
                  dtype=jnp.float32))
    ref_final = ref_w * descends[ep]
    assert jnp.allclose(logits_n, ref_logits, atol=1e-5, rtol=1e-5)
    # alpha/beta = 100 amplify float reordering of the cos rescale -> slightly looser tol.
    assert jnp.allclose(out_weights[:, 0], ref_final, atol=2e-4, rtol=2e-4)
    assert logits_n.shape == (B, C) and out_weights.shape == (B, 1)

    print("KERNEL_OK")
</pallas_src>

<mosaic_0001>
module attributes {stable_mosaic.version = 11 : i64} {
  func.func @_ndw_kernel(%arg0: i32, %arg1: memref<8x1xi32, #tpu.memory_space<vmem>>, %arg2: memref<8x32xf32, #tpu.memory_space<vmem>>, %arg3: memref<32x16xf32, #tpu.memory_space<vmem>>, %arg4: memref<1x16xf32, #tpu.memory_space<vmem>>, %arg5: memref<8x16xf32, #tpu.memory_space<vmem>>, %arg6: memref<8x1xf32, #tpu.memory_space<vmem>>) attributes {dimension_semantics = [#tpu.dimension_semantics<parallel>], iteration_bounds = array<i64: 1>, scalar_prefetch = 0 : i64, scratch_operands = 0 : i64, tpu.core_type = #tpu.core_type<tc>, window_params = [{transform_indices = @transform_0, window_bounds = array<i64: 8, 1>}, {transform_indices = @transform_1, window_bounds = array<i64: 8, 32>}, {pipeline_mode = #tpu.pipeline_mode<synchronous>, transform_indices = @transform_2, window_bounds = array<i64: 32, 16>}, {pipeline_mode = #tpu.pipeline_mode<synchronous>, transform_indices = @transform_3, window_bounds = array<i64: 1, 16>}, {transform_indices = @transform_4, window_bounds = array<i64: 8, 16>}, {transform_indices = @transform_5, window_bounds = array<i64: 8, 1>}]} {
    %c0 = arith.constant 0 : index
    %c0_0 = arith.constant 0 : index
    %0 = vector.load %arg2[%c0, %c0_0] : memref<8x32xf32, #tpu.memory_space<vmem>>, vector<8x32xf32>
    %c0_1 = arith.constant 0 : index
    %c0_2 = arith.constant 0 : index
    %1 = vector.load %arg3[%c0_1, %c0_2] : memref<32x16xf32, #tpu.memory_space<vmem>>, vector<32x16xf32>
    %c0_3 = arith.constant 0 : index
    %c0_4 = arith.constant 0 : index
    %2 = vector.load %arg1[%c0_3, %c0_4] : memref<8x1xi32, #tpu.memory_space<vmem>>, vector<8x1xi32>
    %c0_5 = arith.constant 0 : index
    %c0_6 = arith.constant 0 : index
    %3 = vector.load %arg4[%c0_5, %c0_6] : memref<1x16xf32, #tpu.memory_space<vmem>>, vector<1x16xf32>
    %cst = arith.constant dense<0.000000e+00> : vector<8x16xf32>
    %4 = tpu.matmul %0, %1, %cst {dimension_numbers = #tpu.dot_dimension_numbers<[1], [0], [0], [1], [0, 0, 1, 1], [], []>, precision = #tpu.contract_precision<fp32>} : vector<8x32xf32>, vector<32x16xf32>, vector<8x16xf32> -> vector<8x16xf32>
    %5 = arith.mulf %0, %0 : vector<8x32xf32>
    %cst_7 = arith.constant dense<0.000000e+00> : vector<8xf32>
    %6 = vector.multi_reduction <add>, %5, %cst_7 [1] : vector<8x32xf32> to vector<8xf32>
    %7 = vector.shape_cast %6 : vector<8xf32> to vector<8x1xf32>
    %cst_8 = arith.constant 1.000000e-24 : f32
    %8 = vector.broadcast %cst_8 : f32 to vector<8x1xf32>
    %9 = arith.maximumf %7, %8 : vector<8x1xf32>
    %10 = math.rsqrt %9 : vector<8x1xf32>
    %11 = vector.broadcast %10 : vector<8x1xf32> to vector<8x16xf32>
    %12 = arith.mulf %4, %11 : vector<8x16xf32>
    %13 = vector.broadcast %3 : vector<1x16xf32> to vector<8x16xf32>
    %14 = arith.mulf %12, %13 : vector<8x16xf32>
    %15 = tpu.iota {dimensions = array<i32: 1>} : vector<1x16xi32>
    %16 = vector.broadcast %15 : vector<1x16xi32> to vector<8x16xi32>
    %17 = vector.broadcast %2 : vector<8x1xi32> to vector<8x16xi32>
    %18 = arith.cmpi eq, %16, %17 : vector<8x16xi32>
    %cst_9 = arith.constant 0.000000e+00 : f32
    %19 = vector.broadcast %cst_9 : f32 to vector<8x16xf32>
    %20 = arith.select %18, %14, %19 : vector<8x16xi1>, vector<8x16xf32>
    %cst_10 = arith.constant dense<0.000000e+00> : vector<8xf32>
    %21 = vector.multi_reduction <add>, %20, %cst_10 [1] : vector<8x16xf32> to vector<8xf32>
    %22 = vector.shape_cast %21 : vector<8xf32> to vector<8x1xf32>
    %cst_11 = arith.constant -1.000000e+30 : f32
    %23 = vector.broadcast %cst_11 : f32 to vector<8x16xf32>
    %24 = arith.select %18, %23, %14 : vector<8x16xi1>, vector<8x16xf32>
    %cst_12 = arith.constant dense<0xFF800000> : vector<8xf32>
    %25 = vector.multi_reduction <maximumf>, %24, %cst_12 [1] : vector<8x16xf32> to vector<8xf32>
    %26 = vector.shape_cast %25 : vector<8xf32> to vector<8x1xf32>
    %27 = vector.broadcast %26 : vector<8x1xf32> to vector<8x16xf32>
    %28 = arith.cmpf oeq, %24, %27 : vector<8x16xf32>
    %29 = arith.extui %28 : vector<8x16xi1> to vector<8x16xi32>
    %30 = arith.sitofp %29 : vector<8x16xi32> to vector<8x16xf32>
    %cst_13 = arith.constant dense<0.000000e+00> : vector<8xf32>
    %31 = vector.multi_reduction <add>, %30, %cst_13 [1] : vector<8x16xf32> to vector<8xf32>
    %32 = vector.shape_cast %31 : vector<8xf32> to vector<8x1xf32>
    %cst_14 = arith.constant 2.000000e+00 : f32
    %33 = vector.broadcast %cst_14 : f32 to vector<8x1xf32>
    %34 = arith.minimumf %32, %33 : vector<8x1xf32>
    %35 = arith.mulf %34, %26 : vector<8x1xf32>
    %cst_15 = arith.constant 2.000000e+00 : f32
    %36 = vector.broadcast %cst_15 : f32 to vector<8x1xf32>
    %37 = arith.subf %36, %34 : vector<8x1xf32>
    %38 = vector.broadcast %26 : vector<8x1xf32> to vector<8x16xf32>
    %39 = arith.cmpf oeq, %24, %38 : vector<8x16xf32>
    %cst_16 = arith.constant -1.000000e+30 : f32
    %40 = vector.broadcast %cst_16 : f32 to vector<8x16xf32>
    %41 = arith.select %39, %40, %24 : vector<8x16xi1>, vector<8x16xf32>
    %cst_17 = arith.constant -1.000000e+30 : f32
    %c0_i32 = arith.constant 0 : i32
    %cst_18 = arith.constant dense<0xFF800000> : vector<8xf32>
    %42 = vector.multi_reduction <maximumf>, %41, %cst_18 [1] : vector<8x16xf32> to vector<8xf32>
    %43 = vector.shape_cast %42 : vector<8xf32> to vector<8x1xf32>
    %44 = vector.broadcast %43 : vector<8x1xf32> to vector<8x16xf32>
    %45 = arith.cmpf oeq, %41, %44 : vector<8x16xf32>
    %46 = arith.extui %45 : vector<8x16xi1> to vector<8x16xi32>
    %47 = arith.sitofp %46 : vector<8x16xi32> to vector<8x16xf32>
    %cst_19 = arith.constant dense<0.000000e+00> : vector<8xf32>
    %48 = vector.multi_reduction <add>, %47, %cst_19 [1] : vector<8x16xf32> to vector<8xf32>
    %49 = vector.shape_cast %48 : vector<8xf32> to vector<8x1xf32>
    %50 = arith.minimumf %49, %37 : vector<8x1xf32>
    %51 = arith.mulf %50, %43 : vector<8x1xf32>
    %52 = arith.addf %35, %51 : vector<8x1xf32>
    %53 = arith.subf %37, %50 : vector<8x1xf32>
    %54 = vector.broadcast %43 : vector<8x1xf32> to vector<8x16xf32>
    %55 = arith.cmpf oeq, %41, %54 : vector<8x16xf32>
    %56 = vector.broadcast %cst_17 : f32 to vector<8x16xf32>
    %57 = arith.select %55, %56, %41 : vector<8x16xi1>, vector<8x16xf32>
    %58 = arith.subf %52, %26 : vector<8x1xf32>
    %cst_20 = arith.constant 1.000000e+00 : f32
    %59 = vector.broadcast %cst_20 : f32 to vector<8x1xf32>
    %60 = arith.mulf %58, %59 : vector<8x1xf32>
    %61 = arith.subf %22, %26 : vector<8x1xf32>
    %cst_21 = arith.constant 5.000000e+01 : f32
    %62 = vector.broadcast %cst_21 : f32 to vector<8x1xf32>
    %63 = arith.mulf %62, %61 : vector<8x1xf32>
    %64 = arith.negf %63 : vector<8x1xf32>
    %65 = math.exp %64 : vector<8x1xf32>
    %cst_22 = arith.constant 1.000000e+00 : f32
    %66 = vector.broadcast %cst_22 : f32 to vector<8x1xf32>
    %67 = arith.addf %66, %65 : vector<8x1xf32>
    %68 = arith.divf %66, %67 : vector<8x1xf32>
    %69 = arith.subf %60, %26 : vector<8x1xf32>
    %cst_23 = arith.constant 5.000000e+01 : f32
    %70 = vector.broadcast %cst_23 : f32 to vector<8x1xf32>
    %71 = arith.mulf %70, %69 : vector<8x1xf32>
    %72 = math.exp %71 : vector<8x1xf32>
    %73 = arith.addf %68, %72 : vector<8x1xf32>
    %cst_24 = arith.constant 5.000000e-01 : f32
    %74 = vector.broadcast %cst_24 : f32 to vector<8x1xf32>
    %75 = arith.mulf %74, %73 : vector<8x1xf32>
    %76 = arith.mulf %4, %4 : vector<8x16xf32>
    %cst_25 = arith.constant dense<0.000000e+00> : vector<8xf32>
    %77 = vector.multi_reduction <add>, %76, %cst_25 [1] : vector<8x16xf32> to vector<8xf32>
    %78 = vector.shape_cast %77 : vector<8xf32> to vector<8x1xf32>
    %cst_26 = arith.constant 1.000000e-24 : f32
    %79 = vector.broadcast %cst_26 : f32 to vector<8x1xf32>
    %80 = arith.maximumf %78, %79 : vector<8x1xf32>
    %81 = math.rsqrt %80 : vector<8x1xf32>
    %82 = vector.broadcast %81 : vector<8x1xf32> to vector<8x16xf32>
    %83 = arith.mulf %4, %82 : vector<8x16xf32>
    %c0_27 = arith.constant 0 : index
    %c0_28 = arith.constant 0 : index
    %84 = vector.load %arg5[%c0_27, %c0_28] : memref<8x16xf32, #tpu.memory_space<vmem>>, vector<8x16xf32>
    tpu.vector_store %arg5[%c0_27, %c0_28], %83 {strides = array<i32>} : memref<8x16xf32, #tpu.memory_space<vmem>>, vector<8x16xf32>,
    %c0_29 = arith.constant 0 : index
    %c0_30 = arith.constant 0 : index
    %85 = vector.load %arg6[%c0_29, %c0_30] : memref<8x1xf32, #tpu.memory_space<vmem>>, vector<8x1xf32>
    tpu.vector_store %arg6[%c0_29, %c0_30], %75 {strides = array<i32>} : memref<8x1xf32, #tpu.memory_space<vmem>>, vector<8x1xf32>,
    return
  }
  func.func @transform_0(%arg0: i32) -> (i32, i32) {
    %c0_i32 = arith.constant 0 : i32
    %c0_i32_0 = arith.constant 0 : i32
    return %arg0, %c0_i32 : i32, i32
  }
  func.func @transform_1(%arg0: i32) -> (i32, i32) {
    %c0_i32 = arith.constant 0 : i32
    %c0_i32_0 = arith.constant 0 : i32
    return %arg0, %c0_i32 : i32, i32
  }
  func.func @transform_2(%arg0: i32) -> (i32, i32) {
    %c0_i32 = arith.constant 0 : i32
    %c0_i32_0 = arith.constant 0 : i32
    %c0_i32_1 = arith.constant 0 : i32
    return %c0_i32, %c0_i32_0 : i32, i32
  }
  func.func @transform_3(%arg0: i32) -> (i32, i32) {
    %c0_i32 = arith.constant 0 : i32
    %c0_i32_0 = arith.constant 0 : i32
    %c0_i32_1 = arith.constant 0 : i32
    return %c0_i32, %c0_i32_0 : i32, i32
  }
  func.func @transform_4(%arg0: i32) -> (i32, i32) {
    %c0_i32 = arith.constant 0 : i32
    %c0_i32_0 = arith.constant 0 : i32
    return %arg0, %c0_i32 : i32, i32
  }
  func.func @transform_5(%arg0: i32) -> (i32, i32) {
    %c0_i32 = arith.constant 0 : i32
    %c0_i32_0 = arith.constant 0 : i32
    return %arg0, %c0_i32 : i32, i32
  }
}

module attributes {stable_mosaic.version = 11 : i64} {
  func.func @_ndw_kernel(%arg0: i32, %arg1: memref<8x1xi32, #tpu.memory_space<vmem>>, %arg2: memref<8x32xf32, #tpu.memory_space<vmem>>, %arg3: memref<32x16xf32, #tpu.memory_space<vmem>>, %arg4: memref<1x16xf32, #tpu.memory_space<vmem>>, %arg5: memref<8x16xf32, #tpu.memory_space<vmem>>, %arg6: memref<8x1xf32, #tpu.memory_space<vmem>>) attributes {dimension_semantics = [#tpu.dimension_semantics<parallel>], iteration_bounds = array<i64: 1>, scalar_prefetch = 0 : i64, scratch_operands = 0 : i64, tpu.core_type = #tpu.core_type<tc>, window_params = [{transform_indices = @transform_0, window_bounds = array<i64: 8, 1>}, {transform_indices = @transform_1, window_bounds = array<i64: 8, 32>}, {pipeline_mode = #tpu.pipeline_mode<synchronous>, transform_indices = @transform_2, window_bounds = array<i64: 32, 16>}, {pipeline_mode = #tpu.pipeline_mode<synchronous>, transform_indices = @transform_3, window_bounds = array<i64: 1, 16>}, {transform_indices = @transform_4, window_bounds = array<i64: 8, 16>}, {transform_indices = @transform_5, window_bounds = array<i64: 8, 1>}]} {
    %c0 = arith.constant 0 : index
    %c0_0 = arith.constant 0 : index
    %0 = vector.load %arg2[%c0, %c0_0] : memref<8x32xf32, #tpu.memory_space<vmem>>, vector<8x32xf32>
    %c0_1 = arith.constant 0 : index
    %c0_2 = arith.constant 0 : index
    %1 = vector.load %arg3[%c0_1, %c0_2] : memref<32x16xf32, #tpu.memory_space<vmem>>, vector<32x16xf32>
    %c0_3 = arith.constant 0 : index
    %c0_4 = arith.constant 0 : index
    %2 = vector.load %arg1[%c0_3, %c0_4] : memref<8x1xi32, #tpu.memory_space<vmem>>, vector<8x1xi32>
    %c0_5 = arith.constant 0 : index
    %c0_6 = arith.constant 0 : index
    %3 = vector.load %arg4[%c0_5, %c0_6] : memref<1x16xf32, #tpu.memory_space<vmem>>, vector<1x16xf32>
    %cst = arith.constant dense<0.000000e+00> : vector<8x16xf32>
    %4 = tpu.matmul %0, %1, %cst {dimension_numbers = #tpu.dot_dimension_numbers<[1], [0], [0], [1], [0, 0, 1, 1], [], []>, precision = #tpu.contract_precision<fp32>} : vector<8x32xf32>, vector<32x16xf32>, vector<8x16xf32> -> vector<8x16xf32>
    %5 = arith.mulf %0, %0 : vector<8x32xf32>
    %cst_7 = arith.constant dense<0.000000e+00> : vector<8xf32>
    %6 = vector.multi_reduction <add>, %5, %cst_7 [1] : vector<8x32xf32> to vector<8xf32>
    %7 = vector.shape_cast %6 : vector<8xf32> to vector<8x1xf32>
    %cst_8 = arith.constant 1.000000e-24 : f32
    %8 = vector.broadcast %cst_8 : f32 to vector<8x1xf32>
    %9 = arith.maximumf %7, %8 : vector<8x1xf32>
    %10 = math.rsqrt %9 : vector<8x1xf32>
    %11 = vector.broadcast %10 : vector<8x1xf32> to vector<8x16xf32>
    %12 = arith.mulf %4, %11 : vector<8x16xf32>
    %13 = vector.broadcast %3 : vector<1x16xf32> to vector<8x16xf32>
    %14 = arith.mulf %12, %13 : vector<8x16xf32>
    %15 = tpu.iota {dimensions = array<i32: 1>} : vector<1x16xi32>
    %16 = vector.broadcast %15 : vector<1x16xi32> to vector<8x16xi32>
    %17 = vector.broadcast %2 : vector<8x1xi32> to vector<8x16xi32>
    %18 = arith.cmpi eq, %16, %17 : vector<8x16xi32>
    %cst_9 = arith.constant 0.000000e+00 : f32
    %19 = vector.broadcast %cst_9 : f32 to vector<8x16xf32>
    %20 = arith.select %18, %14, %19 : vector<8x16xi1>, vector<8x16xf32>
    %cst_10 = arith.constant dense<0.000000e+00> : vector<8xf32>
    %21 = vector.multi_reduction <add>, %20, %cst_10 [1] : vector<8x16xf32> to vector<8xf32>
    %22 = vector.shape_cast %21 : vector<8xf32> to vector<8x1xf32>
    %cst_11 = arith.constant -1.000000e+30 : f32
    %23 = vector.broadcast %cst_11 : f32 to vector<8x16xf32>
    %24 = arith.select %18, %23, %14 : vector<8x16xi1>, vector<8x16xf32>
    %cst_12 = arith.constant dense<0xFF800000> : vector<8xf32>
    %25 = vector.multi_reduction <maximumf>, %24, %cst_12 [1] : vector<8x16xf32> to vector<8xf32>
    %26 = vector.shape_cast %25 : vector<8xf32> to vector<8x1xf32>
    %27 = vector.broadcast %26 : vector<8x1xf32> to vector<8x16xf32>
    %28 = arith.cmpf oeq, %24, %27 : vector<8x16xf32>
    %29 = arith.extui %28 : vector<8x16xi1> to vector<8x16xi32>
    %30 = arith.sitofp %29 : vector<8x16xi32> to vector<8x16xf32>
    %cst_13 = arith.constant dense<0.000000e+00> : vector<8xf32>
    %31 = vector.multi_reduction <add>, %30, %cst_13 [1] : vector<8x16xf32> to vector<8xf32>
    %32 = vector.shape_cast %31 : vector<8xf32> to vector<8x1xf32>
    %cst_14 = arith.constant 2.000000e+00 : f32
    %33 = vector.broadcast %cst_14 : f32 to vector<8x1xf32>
    %34 = arith.minimumf %32, %33 : vector<8x1xf32>
    %35 = arith.mulf %34, %26 : vector<8x1xf32>
    %cst_15 = arith.constant 2.000000e+00 : f32
    %36 = vector.broadcast %cst_15 : f32 to vector<8x1xf32>
    %37 = arith.subf %36, %34 : vector<8x1xf32>
    %38 = vector.broadcast %26 : vector<8x1xf32> to vector<8x16xf32>
    %39 = arith.cmpf oeq, %24, %38 : vector<8x16xf32>
    %cst_16 = arith.constant -1.000000e+30 : f32
    %40 = vector.broadcast %cst_16 : f32 to vector<8x16xf32>
    %41 = arith.select %39, %40, %24 : vector<8x16xi1>, vector<8x16xf32>
    %cst_17 = arith.constant -1.000000e+30 : f32
    %c0_i32 = arith.constant 0 : i32
    %cst_18 = arith.constant dense<0xFF800000> : vector<8xf32>
    %42 = vector.multi_reduction <maximumf>, %41, %cst_18 [1] : vector<8x16xf32> to vector<8xf32>
    %43 = vector.shape_cast %42 : vector<8xf32> to vector<8x1xf32>
    %44 = vector.broadcast %43 : vector<8x1xf32> to vector<8x16xf32>
    %45 = arith.cmpf oeq, %41, %44 : vector<8x16xf32>
    %46 = arith.extui %45 : vector<8x16xi1> to vector<8x16xi32>
    %47 = arith.sitofp %46 : vector<8x16xi32> to vector<8x16xf32>
    %cst_19 = arith.constant dense<0.000000e+00> : vector<8xf32>
    %48 = vector.multi_reduction <add>, %47, %cst_19 [1] : vector<8x16xf32> to vector<8xf32>
    %49 = vector.shape_cast %48 : vector<8xf32> to vector<8x1xf32>
    %50 = arith.minimumf %49, %37 : vector<8x1xf32>
    %51 = arith.mulf %50, %43 : vector<8x1xf32>
    %52 = arith.addf %35, %51 : vector<8x1xf32>
    %53 = arith.subf %37, %50 : vector<8x1xf32>
    %54 = vector.broadcast %43 : vector<8x1xf32> to vector<8x16xf32>
    %55 = arith.cmpf oeq, %41, %54 : vector<8x16xf32>
    %56 = vector.broadcast %cst_17 : f32 to vector<8x16xf32>
    %57 = arith.select %55, %56, %41 : vector<8x16xi1>, vector<8x16xf32>
    %58 = arith.subf %52, %26 : vector<8x1xf32>
    %cst_20 = arith.constant 1.000000e+00 : f32
    %59 = vector.broadcast %cst_20 : f32 to vector<8x1xf32>
    %60 = arith.mulf %58, %59 : vector<8x1xf32>
    %61 = arith.subf %22, %26 : vector<8x1xf32>
    %cst_21 = arith.constant 5.000000e+01 : f32
    %62 = vector.broadcast %cst_21 : f32 to vector<8x1xf32>
    %63 = arith.mulf %62, %61 : vector<8x1xf32>
    %64 = arith.negf %63 : vector<8x1xf32>
    %65 = math.exp %64 : vector<8x1xf32>
    %cst_22 = arith.constant 1.000000e+00 : f32
    %66 = vector.broadcast %cst_22 : f32 to vector<8x1xf32>
    %67 = arith.addf %66, %65 : vector<8x1xf32>
    %68 = arith.divf %66, %67 : vector<8x1xf32>
    %69 = arith.subf %60, %26 : vector<8x1xf32>
    %cst_23 = arith.constant 5.000000e+01 : f32
    %70 = vector.broadcast %cst_23 : f32 to vector<8x1xf32>
    %71 = arith.mulf %70, %69 : vector<8x1xf32>
    %72 = math.exp %71 : vector<8x1xf32>
    %73 = arith.addf %68, %72 : vector<8x1xf32>
    %cst_24 = arith.constant 5.000000e-01 : f32
    %74 = vector.broadcast %cst_24 : f32 to vector<8x1xf32>
    %75 = arith.mulf %74, %73 : vector<8x1xf32>
    %76 = arith.mulf %4, %4 : vector<8x16xf32>
    %cst_25 = arith.constant dense<0.000000e+00> : vector<8xf32>
    %77 = vector.multi_reduction <add>, %76, %cst_25 [1] : vector<8x16xf32> to vector<8xf32>
    %78 = vector.shape_cast %77 : vector<8xf32> to vector<8x1xf32>
    %cst_26 = arith.constant 1.000000e-24 : f32
    %79 = vector.broadcast %cst_26 : f32 to vector<8x1xf32>
    %80 = arith.maximumf %78, %79 : vector<8x1xf32>
    %81 = math.rsqrt %80 : vector<8x1xf32>
    %82 = vector.broadcast %81 : vector<8x1xf32> to vector<8x16xf32>
    %83 = arith.mulf %4, %82 : vector<8x16xf32>
    %c0_27 = arith.constant 0 : index
    %c0_28 = arith.constant 0 : index
    %84 = vector.load %arg5[%c0_27, %c0_28] : memref<8x16xf32, #tpu.memory_space<vmem>>, vector<8x16xf32>
    tpu.vector_store %arg5[%c0_27, %c0_28], %83 {strides = array<i32>} : memref<8x16xf32, #tpu.memory_space<vmem>>, vector<8x16xf32>,
    %c0_29 = arith.constant 0 : index
    %c0_30 = arith.constant 0 : index
    %85 = vector.load %arg6[%c0_29, %c0_30] : memref<8x1xf32, #tpu.memory_space<vmem>>, vector<8x1xf32>
    tpu.vector_store %arg6[%c0_29, %c0_30], %75 {strides = array<i32>} : memref<8x1xf32, #tpu.memory_space<vmem>>, vector<8x1xf32>,
    return
  }
  func.func @transform_0(%arg0: i32) -> (i32, i32) {
    %c0_i32 = arith.constant 0 : i32
    %c0_i32_0 = arith.constant 0 : i32
    return %arg0, %c0_i32 : i32, i32
  }
  func.func @transform_1(%arg0: i32) -> (i32, i32) {
    %c0_i32 = arith.constant 0 : i32
    %c0_i32_0 = arith.constant 0 : i32
    return %arg0, %c0_i32 : i32, i32
  }
  func.func @transform_2(%arg0: i32) -> (i32, i32) {
    %c0_i32 = arith.constant 0 : i32
    %c0_i32_0 = arith.constant 0 : i32
    %c0_i32_1 = arith.constant 0 : i32
    return %c0_i32, %c0_i32_0 : i32, i32
  }
  func.func @transform_3(%arg0: i32) -> (i32, i32) {
    %c0_i32 = arith.constant 0 : i32
    %c0_i32_0 = arith.constant 0 : i32
    %c0_i32_1 = arith.constant 0 : i32
    return %c0_i32, %c0_i32_0 : i32, i32
  }
  func.func @transform_4(%arg0: i32) -> (i32, i32) {
    %c0_i32 = arith.constant 0 : i32
    %c0_i32_0 = arith.constant 0 : i32
    return %arg0, %c0_i32 : i32, i32
  }
  func.func @transform_5(%arg0: i32) -> (i32, i32) {
    %c0_i32 = arith.constant 0 : i32
    %c0_i32_0 = arith.constant 0 : i32
    return %arg0, %c0_i32 : i32, i32
  }
}

</mosaic_0001>

<bundles_post_ra>
// kernel: tpu_custom_call.1
= control target key start
LH: loop header
LB: loop body
LE: loop exit
PB: predicated region body
PF: predicated region fallthrough
CT: control target
= control target key end

     0   :  { %vm27_vm0 = vcmask 261120   ;;  %v384_v9 = vmov 0   ;;  %s451_s0 = inlined_call_operand.vmem [shape: s32[8,1], index: 0, kind: input, shape index: {}]   ;;  %s452_s1 = inlined_call_operand.vmem [shape: f32[8,32], index: 1, kind: input, shape index: {}]   ;;  %s453_s2 = inlined_call_operand.vmem [shape: f32[32,16], index: 2, kind: input, shape index: {}]   ;;  %s454_s3 = inlined_call_operand.vmem [shape: f32[1,16], index: 3, kind: input, shape index: {}]   ;;  %s455_s4 = inlined_call_operand.hbm [shape: f32[8,16], index: 4, kind: output, shape index: {0}]   ;;  %s456_s5 = inlined_call_operand.vmem [shape: f32[8,1], index: 5, kind: output, shape index: {1}]  }
   0x1   :  { %v20_v0 = vld [vmem:[%s452_s1] sm:$0xff]  ;;  %v24_v1 = vld [vmem:[%s453_s2 + $0x18] sm:$0xff]  ;;  %v23_v2 = vld [vmem:[%s453_s2 + $0x10] sm:$0xff]  ;;  %346 = vset.pattern.permute.xlu0 %v384_v9 }
   0x2   :  { %v216_v3 = vmul.f32 %v20_v0, %v20_v0  ;;  %v29_v4 = vsel %vm27_vm0, %v20_v0, 0  ;;  %v43_v5 = vand.u32 4294901760, %v24_v1  ;;  %v45_v6 = vand.u32 4294901760, %v23_v2  ;;  %v22_v7 = vld [vmem:[%s453_s2 + $0x8] sm:$0xff]  ;;  %v21_v8 = vld [vmem:[%s453_s2] sm:$0xff] }
   0x3   :  { %v51_v10 = vand.u32 4294901760, %v29_v4  ;;  %v47_v11 = vand.u32 4294901760, %v22_v7  ;;  %v49_v12 = vand.u32 4294901760, %v21_v8 }
   0x4   :  { %v217_v13 = vsel %vm27_vm0, %v216_v3, 0.0  ;;  %v73_v14 = vsub.f32 %v24_v1, %v43_v5  ;;  %44 = vmatpush.msra.mxu0 %v43_v5  ;;  %v79_v15 = vsub.f32 %v23_v2, %v45_v6  ;;  %144 = vmatpush.msra.mxu3 %v43_v5 }
   0x5   :  { %11 = vsyncpa [#allocation3], 0  ;;  %218 = vadd.xlane.f32.xlu0 %v217_v13  ;;  %v52_v16 = vsub.f32 %v29_v4, %v51_v10  ;;  %v85_v17 = vsub.f32 %v22_v7, %v47_v11  ;;  %v91_v18 = vsub.f32 %v21_v8, %v49_v12  ;;  %v25_v34 = vld [vmem:[%s451_s0] sm:$0xff]  ;;  %v236_v49 = vlaneseq  ;;  %s327_s7 = sshll.u32 %s455_s4, 4  ;;  %s328_s7 = int_to_ptr.hbm [resolvable:$true] %s327_s7 }
   0x6   :  { %115 = vmatpush.msra.mxu2 %v73_v14  ;;  %46 = vmatpush.msra.mxu0 %v45_v6  ;;  %v74_v19 = vand.u32 4294901760, %v73_v14  ;;  %v80_v20 = vand.u32 4294901760, %v79_v15  ;;  %v347_v56 = vld [vmem:[%s454_s3] ss:$0 sm:$0xff]  ;;  %vm243_vm5 = vcmask 130048   ;;  %v385_v3 = vmov 0.0  }
   0x7   :  { %146 = vmatpush.msra.mxu3 %v45_v6  ;;  %v86_v21 = vand.u32 4294901760, %v85_v17  ;;  %v53_v22 = vand.u32 4294901760, %v52_v16  ;;  %v92_v23 = vand.u32 4294901760, %v91_v18  ;;  %v237_v54 = vand.u32 127, %v236_v49  ;;  %s386_s3 = smov [#allocation2]  }
   0x8   :  { %118 = vmatpush.msra.mxu2 %v79_v15  ;;  %v75_v24 = vsub.f32 %v73_v14, %v74_v19  ;;  %48 = vmatpush.msra.mxu0 %v47_v11  ;;  %v81_v25 = vsub.f32 %v79_v15, %v80_v20  ;;  %s325_s29 = sshll.u32 %s386_s3, 4  ;;  %vm318_vm15 = vcmask 7168   ;;  %s326_s29 = int_to_ptr.vmem [resolvable:$true] %s325_s29 }
   0x9   :  { %148 = vmatpush.msra.mxu3 %v47_v11  ;;  %v87_v26 = vsub.f32 %v85_v17, %v86_v21  ;;  %v54_v27 = vsub.f32 %v52_v16, %v53_v22  ;;  %v93_v30 = vsub.f32 %v91_v18, %v92_v23 }
   0xa   :  { %v76_v28 = vand.u32 4294901760, %v75_v24  ;;  %121 = vmatpush.msra.mxu2 %v85_v17  ;;  %v82_v29 = vand.u32 4294901760, %v81_v25  ;;  %50 = vmatpush.msra.mxu0 %v49_v12 }
   0xb   :  { %150 = vmatpush.msra.mxu3 %v49_v12  ;;  %v55_v31 = vand.u32 4294901760, %v54_v27  ;;  %v88_v32 = vand.u32 4294901760, %v87_v26  ;;  %v94_v33 = vand.u32 4294901760, %v93_v30 }
   0xc   :  { %173 = vmatpush.msrb.mxu0 %v74_v19  ;;  %77 = vmatpush.msra.mxu1 %v76_v28 }
   0xd   :  { %124 = vmatpush.msra.mxu2 %v91_v18  ;;  %56 = vmatmul.f32.vlgmr.msra.gmra.mxu0 %v55_v31 }
   0xe   :  { %127 = vmatmul.f32.vlgmr.msra.gmra.mxu2 %v52_v16  ;;  %83 = vmatpush.msra.mxu1 %v82_v29 }
   0xf   :  { %154 = vmatmul.f32.vlgmr.msra.gmra.mxu3 %v53_v22  ;;  %177 = vmatpush.msrb.mxu0 %v80_v20 }
  0x10   :  { %89 = vmatpush.msra.mxu1 %v88_v32 }
  0x11   :  { %181 = vmatpush.msrb.mxu0 %v86_v21 }
  0x12   :  { %95 = vmatpush.msra.mxu1 %v94_v33 }
  0x13   :  { %97 = vmatmul.f32.vlgmr.msra.gmra.mxu1 %v51_v10  ;;  %185 = vmatpush.msrb.mxu0 %v92_v23 }
  0x14   :  { %204 = vmatpush.msrb.mxu1 %v43_v5 }
  0x15   :  { %187 = vmatmul.f32.vlgmr.msrb.gmra.mxu0 %v51_v10 }
  0x16   :  { %206 = vmatpush.msrb.mxu1 %v45_v6 }
  0x18   :  { %208 = vmatpush.msrb.mxu1 %v47_v11 }
  0x19   :  { %239 = vperm.xlu0 %346, %v25_v34  }
  0x1a   :  { %210 = vmatpush.msrb.mxu1 %v49_v12 }
  0x1b   :  { %212 = vmatmul.f32.vlgmr.msrb.gmra.mxu1 %v51_v10 }
  0x78   :  { %v219_v35 = vpop.xlane.xlu0 %218 }
  0x79   :  { %v220_v36 = vmax.f32 %v219_v35, 1e-24 }
  0x7b   :  { %348 = vrsqrt.f32 %v220_v36  ;;  %vm227_vm1 = vweird.f32 %v220_v36 }
  0x81   :  { %v349_v37 = vpop.eup %348 }
  0x82   :  { %v222_v38 = vmul.f32 %v349_v37, %v220_v36  ;;  %vm228_vm2 = vweird.f32 %v349_v37 }
  0x83   :  { %vm229_vm3 = vmor %vm227_vm1, %vm228_vm2 }
  0x84   :  { %v223_v39 = vmul.f32 %v349_v37, %v222_v38 }
  0x86   :  { %v224_v41 = vmul.f32 0.5, %v223_v39 }
  0x88   :  { %v225_v45 = vsub.f32 1.5, %v224_v41 }
  0x8a   :  { %v57_v40 = vpop.f32.mrf.mxu0  ;;  %v226_v51 = vmul.f32 %v349_v37, %v225_v45 }
  0x8b   :  { %v240_v57 = vpop.permute.xlu0 %239 }
  0x8c   :  { %v230_v58 = vsel %vm229_vm3, %v349_v37, %v226_v51  ;;  %vm241_vm4 = vcmp.eq.s32.totalorder %v237_v54, %v240_v57 }
  0x90   :  { %v98_v42 = vpop.f32.mrf.mxu1 }
  0x91   :  { %v128_v43 = vpop.f32.mrf.mxu2  ;;  %v99_v44 = vadd.f32 %v98_v42, %v57_v40 }
  0x92   :  { %v155_v46 = vpop.f32.mrf.mxu3  ;;  %v188_v48 = vpop.f32.mrf.mxu0 }
  0x93   :  { %v129_v47 = vadd.f32 %v128_v43, %v99_v44 }
  0x95   :  { %v156_v50 = vadd.f32 %v155_v46, %v129_v47 }
  0x97   :  { %v189_v52 = vadd.f32 %v188_v48, %v156_v50 }
  0x98   :  { %v213_v53 = vpop.f32.mrf.mxu1 }
  0x99   :  { %v214_v55 = vadd.f32 %v213_v53, %v189_v52 }
  0x9b   :  { %v231_v59 = vmul.f32 %v230_v58, %v214_v55  ;;  %v301_v7 = vmul.f32 %v214_v55, %v214_v55 }
  0x9d   :  { %v235_v60 = vmul.f32 %v347_v56, %v231_v59  ;;  %v302_v8 = vsel %vm243_vm5, %v301_v7, 0.0 }
  0x9f   :  { %v247_v61 = vsel %vm241_vm4, -1e+30, %v235_v60  ;;  %v242_v62 = vsel %vm241_vm4, %v235_v60, 0.0 }
  0xa0   :  { %v248_v63 = vsel %vm243_vm5, %v247_v61, -inf  ;;  %v244_v0 = vsel %vm243_vm5, %v242_v62, 0.0 }
  0xa1   :  { %249 = vmax.xlane.f32.xlu1 %v248_v63  ;;  %245 = vadd.xlane.f32.xlu2 %v244_v0 }
 0x114   :  { %v250_v1 = vpop.xlane.xlu1 %249  ;;  %v246_v9 = vpop.xlane.xlu2 %245 }
 0x115   :  { %vm251_vm6 = vcmp.eq.f32.partialorder %v247_v61, %v250_v1  ;;  %v274_v24 = vsub.f32 %v246_v9, %v250_v1 }
 0x116   :  { %v260_v2 = vsel %vm251_vm6, -1e+30, %v247_v61  ;;  %v340_v4 = vsel %vm251_vm6, 1.0, %v385_v3 }
 0x117   :  { %v261_v5 = vsel %vm243_vm5, %v260_v2, -inf  ;;  %v254_v6 = vsel %vm243_vm5, %v340_v4, 0.0  ;;  %v342_v25 = vmul.f32 -50.0, %v274_v24 }
 0x118   :  { %262 = vmax.xlane.f32.xlu1 %v261_v5  ;;  %255 = vadd.xlane.f32.xlu2 %v254_v6 }
 0x119   :  { %v277_v26 = vmul.f32 1.442695, %v342_v25 }
 0x120   :  { %303 = vadd.xlane.f32.xlu2 %v302_v8 }
 0x18b   :  { %v263_v10 = vpop.xlane.xlu1 %262  ;;  %v256_v11 = vpop.xlane.xlu2 %255 }
 0x18c   :  { %vm264_vm7 = vcmp.eq.f32.partialorder %v260_v2, %v263_v10  ;;  %v257_v29 = vmin.f32 %v256_v11, 2.0 }
 0x18d   :  { %v341_v12 = vsel %vm264_vm7, 1.0, %v385_v3 }
 0x18e   :  { %v267_v13 = vsel %vm243_vm5, %v341_v12, 0.0  ;;  %v259_v31 = vsub.f32 2.0, %v257_v29  ;;  %v258_v35 = vmul.f32 %v257_v29, %v250_v1 }
 0x18f   :  { %268 = vadd.xlane.f32.xlu1 %v267_v13 }
 0x193   :  { %v304_v14 = vpop.xlane.xlu2 %303 }
 0x194   :  { %v305_v15 = vmax.f32 %v304_v14, 1e-24 }
 0x196   :  { %350 = vrsqrt.f32 %v305_v15  ;;  %vm312_vm9 = vweird.f32 %v305_v15 }
 0x197   :  { %352 = vpow2.f32 %v277_v26 }
 0x19c   :  { %v351_v16 = vpop.eup %350 }
 0x19d   :  { %v307_v17 = vmul.f32 %v351_v16, %v305_v15  ;;  %vm313_vm8 = vweird.f32 %v351_v16  ;;  %v353_v27 = vpop.eup %352 }
 0x19e   :  { %vm314_vm10 = vmor %vm312_vm9, %vm313_vm8  ;;  %v279_v28 = vadd.f32 1.0, %v353_v27 }
 0x19f   :  { %v308_v18 = vmul.f32 %v351_v16, %v307_v17 }
 0x1a0   :  { %354 = vrcp.f32 %v279_v28  ;;  %v291_v45 = vand.u32 2147483648, %v279_v28  ;;  %vm285_vm12 = vweird.f32 %v279_v28  ;;  %v289_v46 = vand.u32 2147483647, %v279_v28 }
 0x1a1   :  { %v309_v19 = vmul.f32 0.5, %v308_v18 }
 0x1a2   :  { %v292_v48 = vor.u32 1.1754944e-38, %v291_v45  ;;  %vm290_vm14 = vcmp.eq.f32.partialorder %v289_v46, 8.507059e+37 }
 0x1a3   :  { %v310_v20 = vsub.f32 1.5, %v309_v19 }
 0x1a5   :  { %v311_v21 = vmul.f32 %v351_v16, %v310_v20 }
 0x1a6   :  { %v355_v30 = vpop.eup %354 }
 0x1a7   :  { %v315_v22 = vsel %vm314_vm10, %v351_v16, %v311_v21  ;;  %v281_v34 = vmul.f32 %v355_v30, %v279_v28  ;;  %vm286_vm11 = vweird.f32 %v355_v30 }
 0x1a8   :  { %v316_v23 = vmul.f32 %v315_v22, %v214_v55  ;;  %vm287_vm13 = vmor %vm285_vm12, %vm286_vm11 }
 0x1a9   :  { %v282_v38 = vsub.f32 1.0, %v281_v34 }
 0x1aa   :  { %317 = vst.msk [vmem:[#allocation2] sm:$0xff] %vm243_vm5, %v316_v23 }
 0x1ab   :  { %330 = dma.vmem_to_hbm [thread:$0]  %s326_s29, 128, %s328_s7, [#allocation3]   ;;  %v283_v41 = vmul.f32 %v355_v30, %v282_v38 }
 0x1ad   :  { %v284_v44 = vadd.f32 %v355_v30, %v283_v41 }
 0x1af   :  { %v288_v47 = vsel %vm287_vm13, %v355_v30, %v284_v44 }
 0x1b0   :  { %v293_v50 = vsel %vm290_vm14, %v292_v48, %v288_v47 }
 0x202   :  { %v269_v32 = vpop.xlane.xlu1 %268 }
 0x203   :  { %v270_v33 = vmin.f32 %v269_v32, %v259_v31 }
 0x205   :  { %v271_v36 = vmul.f32 %v270_v33, %v263_v10 }
 0x207   :  { %v272_v37 = vadd.f32 %v271_v36, %v258_v35 }
 0x209   :  { %v273_v39 = vsub.f32 %v272_v37, %v250_v1 }
 0x20b   :  { %v295_v40 = vsub.f32 %v273_v39, %v250_v1 }
 0x20d   :  { %v296_v42 = vmul.f32 50.0, %v295_v40 }
 0x20f   :  { %v297_v43 = vmul.f32 1.442695, %v296_v42 }
 0x211   :  { %356 = vpow2.f32 %v297_v43 }
 0x217   :  { %v357_v49 = vpop.eup %356 }
 0x218   :  { %v299_v51 = vadd.f32 %v357_v49, %v293_v50 }
 0x21a   :  { %v300_v52 = vmul.f32 0.5, %v299_v51 }
 0x21c   :  { %319 = vst.msk [vmem:[%s456_s5] sm:$0xff] %vm318_vm15, %v300_v52 }
 0x21d   :  { %382 = dma.done.wait [#allocation3], 128  }
 0x21e   :  { %383 = vsyncadd [#allocation3], 4294967168 }
 0x21f   :  { %339 = vsyncpa [#allocation3], 1 }

// kernel: tpu_custom_call.1
= control target key start
LH: loop header
LB: loop body
LE: loop exit
PB: predicated region body
PF: predicated region fallthrough
CT: control target
= control target key end

     0   :  { %vm27_vm0 = vcmask 261120   ;;  %v384_v9 = vmov 0   ;;  %s451_s0 = inlined_call_operand.vmem [shape: s32[8,1], index: 0, kind: input, shape index: {}]   ;;  %s452_s1 = inlined_call_operand.vmem [shape: f32[8,32], index: 1, kind: input, shape index: {}]   ;;  %s453_s2 = inlined_call_operand.vmem [shape: f32[32,16], index: 2, kind: input, shape index: {}]   ;;  %s454_s3 = inlined_call_operand.vmem [shape: f32[1,16], index: 3, kind: input, shape index: {}]   ;;  %s455_s4 = inlined_call_operand.hbm [shape: f32[8,16], index: 4, kind: output, shape index: {0}]   ;;  %s456_s5 = inlined_call_operand.vmem [shape: f32[8,1], index: 5, kind: output, shape index: {1}]  }
   0x1   :  { %v20_v0 = vld [vmem:[%s452_s1] sm:$0xff]  ;;  %v24_v1 = vld [vmem:[%s453_s2 + $0x18] sm:$0xff]  ;;  %v23_v2 = vld [vmem:[%s453_s2 + $0x10] sm:$0xff]  ;;  %346 = vset.pattern.permute.xlu0 %v384_v9 }
   0x2   :  { %v216_v3 = vmul.f32 %v20_v0, %v20_v0  ;;  %v29_v4 = vsel %vm27_vm0, %v20_v0, 0  ;;  %v43_v5 = vand.u32 4294901760, %v24_v1  ;;  %v45_v6 = vand.u32 4294901760, %v23_v2  ;;  %v22_v7 = vld [vmem:[%s453_s2 + $0x8] sm:$0xff]  ;;  %v21_v8 = vld [vmem:[%s453_s2] sm:$0xff] }
   0x3   :  { %v51_v10 = vand.u32 4294901760, %v29_v4  ;;  %v47_v11 = vand.u32 4294901760, %v22_v7  ;;  %v49_v12 = vand.u32 4294901760, %v21_v8 }
   0x4   :  { %v217_v13 = vsel %vm27_vm0, %v216_v3, 0.0  ;;  %v73_v14 = vsub.f32 %v24_v1, %v43_v5  ;;  %44 = vmatpush.msra.mxu0 %v43_v5  ;;  %v79_v15 = vsub.f32 %v23_v2, %v45_v6  ;;  %144 = vmatpush.msra.mxu3 %v43_v5 }
   0x5   :  { %11 = vsyncpa [#allocation3], 0  ;;  %218 = vadd.xlane.f32.xlu0 %v217_v13  ;;  %v52_v16 = vsub.f32 %v29_v4, %v51_v10  ;;  %v85_v17 = vsub.f32 %v22_v7, %v47_v11  ;;  %v91_v18 = vsub.f32 %v21_v8, %v49_v12  ;;  %v25_v34 = vld [vmem:[%s451_s0] sm:$0xff]  ;;  %v236_v49 = vlaneseq  ;;  %s327_s7 = sshll.u32 %s455_s4, 4  ;;  %s328_s7 = int_to_ptr.hbm [resolvable:$true] %s327_s7 }
   0x6   :  { %115 = vmatpush.msra.mxu2 %v73_v14  ;;  %46 = vmatpush.msra.mxu0 %v45_v6  ;;  %v74_v19 = vand.u32 4294901760, %v73_v14  ;;  %v80_v20 = vand.u32 4294901760, %v79_v15  ;;  %v347_v56 = vld [vmem:[%s454_s3] ss:$0 sm:$0xff]  ;;  %vm243_vm5 = vcmask 130048   ;;  %v385_v3 = vmov 0.0  }
   0x7   :  { %146 = vmatpush.msra.mxu3 %v45_v6  ;;  %v86_v21 = vand.u32 4294901760, %v85_v17  ;;  %v53_v22 = vand.u32 4294901760, %v52_v16  ;;  %v92_v23 = vand.u32 4294901760, %v91_v18  ;;  %v237_v54 = vand.u32 127, %v236_v49  ;;  %s386_s3 = smov [#allocation2]  }
   0x8   :  { %118 = vmatpush.msra.mxu2 %v79_v15  ;;  %v75_v24 = vsub.f32 %v73_v14, %v74_v19  ;;  %48 = vmatpush.msra.mxu0 %v47_v11  ;;  %v81_v25 = vsub.f32 %v79_v15, %v80_v20  ;;  %s325_s29 = sshll.u32 %s386_s3, 4  ;;  %vm318_vm15 = vcmask 7168   ;;  %s326_s29 = int_to_ptr.vmem [resolvable:$true] %s325_s29 }
   0x9   :  { %148 = vmatpush.msra.mxu3 %v47_v11  ;;  %v87_v26 = vsub.f32 %v85_v17, %v86_v21  ;;  %v54_v27 = vsub.f32 %v52_v16, %v53_v22  ;;  %v93_v30 = vsub.f32 %v91_v18, %v92_v23 }
   0xa   :  { %v76_v28 = vand.u32 4294901760, %v75_v24  ;;  %121 = vmatpush.msra.mxu2 %v85_v17  ;;  %v82_v29 = vand.u32 4294901760, %v81_v25  ;;  %50 = vmatpush.msra.mxu0 %v49_v12 }
   0xb   :  { %150 = vmatpush.msra.mxu3 %v49_v12  ;;  %v55_v31 = vand.u32 4294901760, %v54_v27  ;;  %v88_v32 = vand.u32 4294901760, %v87_v26  ;;  %v94_v33 = vand.u32 4294901760, %v93_v30 }
   0xc   :  { %173 = vmatpush.msrb.mxu0 %v74_v19  ;;  %77 = vmatpush.msra.mxu1 %v76_v28 }
   0xd   :  { %124 = vmatpush.msra.mxu2 %v91_v18  ;;  %56 = vmatmul.f32.vlgmr.msra.gmra.mxu0 %v55_v31 }
   0xe   :  { %127 = vmatmul.f32.vlgmr.msra.gmra.mxu2 %v52_v16  ;;  %83 = vmatpush.msra.mxu1 %v82_v29 }
   0xf   :  { %154 = vmatmul.f32.vlgmr.msra.gmra.mxu3 %v53_v22  ;;  %177 = vmatpush.msrb.mxu0 %v80_v20 }
  0x10   :  { %89 = vmatpush.msra.mxu1 %v88_v32 }
  0x11   :  { %181 = vmatpush.msrb.mxu0 %v86_v21 }
  0x12   :  { %95 = vmatpush.msra.mxu1 %v94_v33 }
  0x13   :  { %97 = vmatmul.f32.vlgmr.msra.gmra.mxu1 %v51_v10  ;;  %185 = vmatpush.msrb.mxu0 %v92_v23 }
  0x14   :  { %204 = vmatpush.msrb.mxu1 %v43_v5 }
  0x15   :  { %187 = vmatmul.f32.vlgmr.msrb.gmra.mxu0 %v51_v10 }
  0x16   :  { %206 = vmatpush.msrb.mxu1 %v45_v6 }
  0x18   :  { %208 = vmatpush.msrb.mxu1 %v47_v11 }
  0x19   :  { %239 = vperm.xlu0 %346, %v25_v34  }
  0x1a   :  { %210 = vmatpush.msrb.mxu1 %v49_v12 }
  0x1b   :  { %212 = vmatmul.f32.vlgmr.msrb.gmra.mxu1 %v51_v10 }
  0x78   :  { %v219_v35 = vpop.xlane.xlu0 %218 }
  0x79   :  { %v220_v36 = vmax.f32 %v219_v35, 1e-24 }
  0x7b   :  { %348 = vrsqrt.f32 %v220_v36  ;;  %vm227_vm1 = vweird.f32 %v220_v36 }
  0x81   :  { %v349_v37 = vpop.eup %348 }
  0x82   :  { %v222_v38 = vmul.f32 %v349_v37, %v220_v36  ;;  %vm228_vm2 = vweird.f32 %v349_v37 }
  0x83   :  { %vm229_vm3 = vmor %vm227_vm1, %vm228_vm2 }
  0x84   :  { %v223_v39 = vmul.f32 %v349_v37, %v222_v38 }
  0x86   :  { %v224_v41 = vmul.f32 0.5, %v223_v39 }
  0x88   :  { %v225_v45 = vsub.f32 1.5, %v224_v41 }
  0x8a   :  { %v57_v40 = vpop.f32.mrf.mxu0  ;;  %v226_v51 = vmul.f32 %v349_v37, %v225_v45 }
  0x8b   :  { %v240_v57 = vpop.permute.xlu0 %239 }
  0x8c   :  { %v230_v58 = vsel %vm229_vm3, %v349_v37, %v226_v51  ;;  %vm241_vm4 = vcmp.eq.s32.totalorder %v237_v54, %v240_v57 }
  0x90   :  { %v98_v42 = vpop.f32.mrf.mxu1 }
  0x91   :  { %v128_v43 = vpop.f32.mrf.mxu2  ;;  %v99_v44 = vadd.f32 %v98_v42, %v57_v40 }
  0x92   :  { %v155_v46 = vpop.f32.mrf.mxu3  ;;  %v188_v48 = vpop.f32.mrf.mxu0 }
  0x93   :  { %v129_v47 = vadd.f32 %v128_v43, %v99_v44 }
  0x95   :  { %v156_v50 = vadd.f32 %v155_v46, %v129_v47 }
  0x97   :  { %v189_v52 = vadd.f32 %v188_v48, %v156_v50 }
  0x98   :  { %v213_v53 = vpop.f32.mrf.mxu1 }
  0x99   :  { %v214_v55 = vadd.f32 %v213_v53, %v189_v52 }
  0x9b   :  { %v231_v59 = vmul.f32 %v230_v58, %v214_v55  ;;  %v301_v7 = vmul.f32 %v214_v55, %v214_v55 }
  0x9d   :  { %v235_v60 = vmul.f32 %v347_v56, %v231_v59  ;;  %v302_v8 = vsel %vm243_vm5, %v301_v7, 0.0 }
  0x9f   :  { %v247_v61 = vsel %vm241_vm4, -1e+30, %v235_v60  ;;  %v242_v62 = vsel %vm241_vm4, %v235_v60, 0.0 }
  0xa0   :  { %v248_v63 = vsel %vm243_vm5, %v247_v61, -inf  ;;  %v244_v0 = vsel %vm243_vm5, %v242_v62, 0.0 }
  0xa1   :  { %249 = vmax.xlane.f32.xlu1 %v248_v63  ;;  %245 = vadd.xlane.f32.xlu2 %v244_v0 }
 0x114   :  { %v250_v1 = vpop.xlane.xlu1 %249  ;;  %v246_v9 = vpop.xlane.xlu2 %245 }
 0x115   :  { %vm251_vm6 = vcmp.eq.f32.partialorder %v247_v61, %v250_v1  ;;  %v274_v24 = vsub.f32 %v246_v9, %v250_v1 }
 0x116   :  { %v260_v2 = vsel %vm251_vm6, -1e+30, %v247_v61  ;;  %v340_v4 = vsel %vm251_vm6, 1.0, %v385_v3 }
 0x117   :  { %v261_v5 = vsel %vm243_vm5, %v260_v2, -inf  ;;  %v254_v6 = vsel %vm243_vm5, %v340_v4, 0.0  ;;  %v342_v25 = vmul.f32 -50.0, %v274_v24 }
 0x118   :  { %262 = vmax.xlane.f32.xlu1 %v261_v5  ;;  %255 = vadd.xlane.f32.xlu2 %v254_v6 }
 0x119   :  { %v277_v26 = vmul.f32 1.442695, %v342_v25 }
 0x120   :  { %303 = vadd.xlane.f32.xlu2 %v302_v8 }
 0x18b   :  { %v263_v10 = vpop.xlane.xlu1 %262  ;;  %v256_v11 = vpop.xlane.xlu2 %255 }
 0x18c   :  { %vm264_vm7 = vcmp.eq.f32.partialorder %v260_v2, %v263_v10  ;;  %v257_v29 = vmin.f32 %v256_v11, 2.0 }
 0x18d   :  { %v341_v12 = vsel %vm264_vm7, 1.0, %v385_v3 }
 0x18e   :  { %v267_v13 = vsel %vm243_vm5, %v341_v12, 0.0  ;;  %v259_v31 = vsub.f32 2.0, %v257_v29  ;;  %v258_v35 = vmul.f32 %v257_v29, %v250_v1 }
 0x18f   :  { %268 = vadd.xlane.f32.xlu1 %v267_v13 }
 0x193   :  { %v304_v14 = vpop.xlane.xlu2 %303 }
 0x194   :  { %v305_v15 = vmax.f32 %v304_v14, 1e-24 }
 0x196   :  { %350 = vrsqrt.f32 %v305_v15  ;;  %vm312_vm9 = vweird.f32 %v305_v15 }
 0x197   :  { %352 = vpow2.f32 %v277_v26 }
 0x19c   :  { %v351_v16 = vpop.eup %350 }
 0x19d   :  { %v307_v17 = vmul.f32 %v351_v16, %v305_v15  ;;  %vm313_vm8 = vweird.f32 %v351_v16  ;;  %v353_v27 = vpop.eup %352 }
 0x19e   :  { %vm314_vm10 = vmor %vm312_vm9, %vm313_vm8  ;;  %v279_v28 = vadd.f32 1.0, %v353_v27 }
 0x19f   :  { %v308_v18 = vmul.f32 %v351_v16, %v307_v17 }
 0x1a0   :  { %354 = vrcp.f32 %v279_v28  ;;  %v291_v45 = vand.u32 2147483648, %v279_v28  ;;  %vm285_vm12 = vweird.f32 %v279_v28  ;;  %v289_v46 = vand.u32 2147483647, %v279_v28 }
 0x1a1   :  { %v309_v19 = vmul.f32 0.5, %v308_v18 }
 0x1a2   :  { %v292_v48 = vor.u32 1.1754944e-38, %v291_v45  ;;  %vm290_vm14 = vcmp.eq.f32.partialorder %v289_v46, 8.507059e+37 }
 0x1a3   :  { %v310_v20 = vsub.f32 1.5, %v309_v19 }
 0x1a5   :  { %v311_v21 = vmul.f32 %v351_v16, %v310_v20 }
 0x1a6   :  { %v355_v30 = vpop.eup %354 }
 0x1a7   :  { %v315_v22 = vsel %vm314_vm10, %v351_v16, %v311_v21  ;;  %v281_v34 = vmul.f32 %v355_v30, %v279_v28  ;;  %vm286_vm11 = vweird.f32 %v355_v30 }
 0x1a8   :  { %v316_v23 = vmul.f32 %v315_v22, %v214_v55  ;;  %vm287_vm13 = vmor %vm285_vm12, %vm286_vm11 }
 0x1a9   :  { %v282_v38 = vsub.f32 1.0, %v281_v34 }
 0x1aa   :  { %317 = vst.msk [vmem:[#allocation2] sm:$0xff] %vm243_vm5, %v316_v23 }
 0x1ab   :  { %330 = dma.vmem_to_hbm [thread:$0]  %s326_s29, 128, %s328_s7, [#allocation3]   ;;  %v283_v41 = vmul.f32 %v355_v30, %v282_v38 }
 0x1ad   :  { %v284_v44 = vadd.f32 %v355_v30, %v283_v41 }
 0x1af   :  { %v288_v47 = vsel %vm287_vm13, %v355_v30, %v284_v44 }
 0x1b0   :  { %v293_v50 = vsel %vm290_vm14, %v292_v48, %v288_v47 }
 0x202   :  { %v269_v32 = vpop.xlane.xlu1 %268 }
 0x203   :  { %v270_v33 = vmin.f32 %v269_v32, %v259_v31 }
 0x205   :  { %v271_v36 = vmul.f32 %v270_v33, %v263_v10 }
 0x207   :  { %v272_v37 = vadd.f32 %v271_v36, %v258_v35 }
 0x209   :  { %v273_v39 = vsub.f32 %v272_v37, %v250_v1 }
 0x20b   :  { %v295_v40 = vsub.f32 %v273_v39, %v250_v1 }
 0x20d   :  { %v296_v42 = vmul.f32 50.0, %v295_v40 }
 0x20f   :  { %v297_v43 = vmul.f32 1.442695, %v296_v42 }
 0x211   :  { %356 = vpow2.f32 %v297_v43 }
 0x217   :  { %v357_v49 = vpop.eup %356 }
 0x218   :  { %v299_v51 = vadd.f32 %v357_v49, %v293_v50 }
 0x21a   :  { %v300_v52 = vmul.f32 0.5, %v299_v51 }
 0x21c   :  { %319 = vst.msk [vmem:[%s456_s5] sm:$0xff] %vm318_vm15, %v300_v52 }
 0x21d   :  { %382 = dma.done.wait [#allocation3], 128  }
 0x21e   :  { %383 = vsyncadd [#allocation3], 4294967168 }
 0x21f   :  { %339 = vsyncpa [#allocation3], 1 }

</bundles_post_ra>
